<compile_context>
chip_gen: v6e
topology: v6e:2x2x1
jax: 0.10.0
libtpu: 0.0.40
codegen_flags: <defaults>
</compile_context>

<pallas_src>
import jax
import jax.numpy as jnp
from jax.experimental import pallas as pl
from jax.experimental.pallas import tpu as pltpu


def patch_embed_kernel(patches_ref, wt_ref, pos_ref, o_ref):
    """out_tile = patches_tile @ W^T + pos_tile   (f32 MXU accumulation)."""
    acc = jnp.dot(patches_ref[...], wt_ref[...],
                  preferred_element_type=jnp.float32)        # (TN, d) f32
    o_ref[...] = (acc + pos_ref[...]).astype(o_ref.dtype)    # pos table is f32


def embeddings_forward(x, conv_w, conv_b, cls_token, positions, patch_size,
                       compute_dtype=jnp.bfloat16, out_dtype=None):
    """ViT Embeddings forward.

    x:         (batch, in_channels, H, W)
    conv_w:    (d_size, in_channels, P, P)    conv_b: (d_size,)
    cls_token: (1, d_size, 1)                 positions: (1, d_size, n_patches+1)
    returns    (batch, n_patches+1, d_size)
    """
    B, C, H, W = x.shape
    P = patch_size
    d = conv_w.shape[0]
    gh, gw = H // P, W // P
    n_patches = gh * gw
    n_rows = n_patches + 1                      # CLS row fused into the kernel
    K = C * P * P
    K_pad = ((K + 127) // 128) * 128            # lane-aligned MXU contraction dim
    out_dtype = x.dtype if out_dtype is None else out_dtype

    # im2col: stride==kernel conv == per-patch flatten with (c, kh, kw) ordering,
    # matching the OIHW conv weight layout; patch index = gh_idx * gw + gw_idx,
    # same ordering as Conv2d(...).flatten(2).
    patches = (x.reshape(B, C, gh, P, gw, P)
                 .transpose(0, 2, 4, 1, 3, 5)
                 .reshape(B, n_patches, K)).astype(compute_dtype)
    # Prepend an all-zero "patch" (row 0 -> matmul contributes 0 -> output row 0
    # becomes exactly cls_token + positions[:, :, 0]) and zero-pad K to K_pad.
    patches = jnp.pad(patches, ((0, 0), (1, 0), (0, K_pad - K)))

    # (K_pad, d) weight, zero rows for the padded contraction lanes.
    wT = jnp.pad(conv_w.reshape(d, K).T.astype(compute_dtype),
                 ((0, K_pad - K), (0, 0)))

    # Fused (n_rows, d) f32 additive table:
    #   row 0            = cls_token + positions[:, :, 0]          (no conv bias)
    #   rows 1..n_rows-1 = positions[:, :, 1:].T + conv_b
    pos_cls = jnp.concatenate(
        [(cls_token[0, :, 0] + positions[0, :, 0]).reshape(1, d),
         positions[0, :, 1:].T + conv_b[None, :]],
        axis=0).astype(jnp.float32)

    # Row tile along the (n_patches+1) axis.
    if n_rows <= 512:
        TN = n_rows
        if B == 1 and n_rows >= 16:
            # Force >=2 grid programs so both v7x TensorCores get work at B=1.
            TN = max(8, (((n_rows + 1) // 2 + 7) // 8) * 8)
    else:
        TN = 512
    num_tiles = pl.cdiv(n_rows, TN)
    grid = (num_tiles, B)                       # tiles slowest -> pos fetched once/tile

    itm = jnp.dtype(compute_dtype).itemsize
    out_itm = jnp.dtype(out_dtype).itemsize
    # Double-buffered patch/pos/out tiles + resident weight, 2x headroom,
    # clamped to [32 MiB, 64 MiB] (safe on v5e/v6e/v7x).
    est = (2 * TN * K_pad * itm + 2 * TN * d * 4
           + 2 * TN * d * out_itm + 2 * K_pad * d * itm)
    vmem_limit = int(min(max(2 * est, 32 << 20), 64 << 20))

    cost = pl.CostEstimate(
        flops=2 * B * n_rows * K_pad * d,
        transcendentals=0,
        bytes_accessed=int(B * n_rows * K_pad * itm       # patches (read once)
                           + K_pad * d * itm              # weight (resident)
                           + n_rows * d * 4               # pos table (once/tile)
                           + B * n_rows * d * out_itm))   # output

    out = pl.pallas_call(
        patch_embed_kernel,
        out_shape=jax.ShapeDtypeStruct((B, n_rows, d), out_dtype),
        grid_spec=pltpu.PrefetchScalarGridSpec(
            num_scalar_prefetch=0,
            grid=grid,
            in_specs=[
                # (batch squeezed, row-tile, K_pad)
                pl.BlockSpec((None, TN, K_pad), lambda t, b: (b, t, 0)),
                # weight: constant index_map -> resident across the grid
                pl.BlockSpec((K_pad, d), lambda t, b: (0, 0)),
                # pos/bias/cls table: depends only on the slowest axis
                pl.BlockSpec((TN, d), lambda t, b: (t, 0)),
            ],
            out_specs=pl.BlockSpec((None, TN, d), lambda t, b: (b, t, 0)),
        ),
        compiler_params=pltpu.CompilerParams(
            dimension_semantics=("parallel", "parallel"),
            vmem_limit_bytes=vmem_limit),
        cost_estimate=cost,
    )(patches, wT, pos_cls)

    # TODO(synk): emb_drop (Dropout(p_emb)) is identity in eval mode; training-mode
    # dropout (pltpu.prng_random_bits mask) intentionally not applied here.
    return out


if __name__ == "__main__":
    # Small shapes consistent with the module:
    #   x: (batch, in_channels, img_size, img_size), n_patches = (img/patch)^2
    batch, in_channels, img_size, patch_size, d_size = 2, 4, 16, 4, 32
    n_patches = (img_size // patch_size) ** 2                   # 16
    fan_in = in_channels * patch_size * patch_size              # 64

    key = jax.random.PRNGKey(0)
    kx, kw, kb, kp, kc = jax.random.split(key, 5)
    x = jax.random.normal(kx, (batch, in_channels, img_size, img_size), jnp.float32)

    # Conv2d-default init (uniform +/- 1/sqrt(fan_in)). The module inits
    # positions / cls_token to zeros; use small random values here so the
    # position / cls paths are actually exercised by the check.
    bound = 1.0 / (fan_in ** 0.5)
    conv_w = jax.random.uniform(kw, (d_size, in_channels, patch_size, patch_size),
                                jnp.float32, -bound, bound)
    conv_b = jax.random.uniform(kb, (d_size,), jnp.float32, -bound, bound)
    positions = 0.02 * jax.random.normal(kp, (1, d_size, n_patches + 1), jnp.float32)
    cls_token = 0.02 * jax.random.normal(kc, (1, d_size, 1), jnp.float32)

    out = embeddings_forward(x, conv_w, conv_b, cls_token, positions, patch_size)
    jax.block_until_ready(out)

    # Full-precision reference using the real strided convolution.
    conv_out = jax.lax.conv_general_dilated(
        x, conv_w, window_strides=(patch_size, patch_size), padding="VALID",
        dimension_numbers=("NCHW", "OIHW", "NCHW"))             # (B, d, gh, gw)
    conv_out = conv_out.reshape(batch, d_size, n_patches) + conv_b[None, :, None]
    patch_emb = jnp.concatenate(
        [jnp.broadcast_to(cls_token, (batch, d_size, 1)), conv_out], axis=-1)
    ref = jnp.transpose(patch_emb + positions, (0, 2, 1))        # (B, n_patches+1, d)

    assert out.shape == (batch, n_patches + 1, d_size)
    # bf16 matmul inputs (f32 accumulation) vs. f32 reference -> bf16-level tolerance.
    max_err = float(jnp.max(jnp.abs(out - ref)))
    assert jnp.allclose(out, ref, atol=2e-2, rtol=2e-2), f"max abs err {max_err}"

    print("KERNEL_OK")
</pallas_src>

<mosaic_0001>
module attributes {stable_mosaic.version = 11 : i64} {
  func.func @patch_embed_kernel(%arg0: i32, %arg1: i32, %arg2: memref<1x17x128xbf16, #tpu.memory_space<vmem>>, %arg3: memref<128x32xbf16, #tpu.memory_space<vmem>>, %arg4: memref<17x32xf32, #tpu.memory_space<vmem>>, %arg5: memref<1x17x32xf32, #tpu.memory_space<vmem>>) attributes {dimension_semantics = [#tpu.dimension_semantics<parallel>, #tpu.dimension_semantics<parallel>], iteration_bounds = array<i64: 1, 2>, scalar_prefetch = 0 : i64, scratch_operands = 0 : i64, tpu.core_type = #tpu.core_type<tc>, window_params = [{transform_indices = @transform_0, window_bounds = array<i64: 1, 17, 128>}, {pipeline_mode = #tpu.pipeline_mode<synchronous>, transform_indices = @transform_1, window_bounds = array<i64: 128, 32>}, {transform_indices = @transform_2, window_bounds = array<i64: 17, 32>}, {transform_indices = @transform_3, window_bounds = array<i64: 1, 17, 32>}]} {
    %c0 = arith.constant 0 : index
    %c0_0 = arith.constant 0 : index
    %c0_1 = arith.constant 0 : index
    %0 = vector.load %arg2[%c0, %c0_0, %c0_1] : memref<1x17x128xbf16, #tpu.memory_space<vmem>>, vector<1x17x128xbf16>
    %1 = vector.shape_cast %0 : vector<1x17x128xbf16> to vector<17x128xbf16>
    %c0_2 = arith.constant 0 : index
    %c0_3 = arith.constant 0 : index
    %2 = vector.load %arg3[%c0_2, %c0_3] : memref<128x32xbf16, #tpu.memory_space<vmem>>, vector<128x32xbf16>
    %cst = arith.constant dense<0.000000e+00> : vector<17x32xf32>
    %3 = tpu.matmul %1, %2, %cst {dimension_numbers = #tpu.dot_dimension_numbers<[1], [0], [0], [1], [0, 0, 1, 1], [], []>} : vector<17x128xbf16>, vector<128x32xbf16>, vector<17x32xf32> -> vector<17x32xf32>
    %c0_4 = arith.constant 0 : index
    %c0_5 = arith.constant 0 : index
    %4 = vector.load %arg4[%c0_4, %c0_5] : memref<17x32xf32, #tpu.memory_space<vmem>>, vector<17x32xf32>
    %5 = arith.addf %3, %4 : vector<17x32xf32>
    %c0_6 = arith.constant 0 : index
    %c0_7 = arith.constant 0 : index
    %c0_8 = arith.constant 0 : index
    %6 = vector.load %arg5[%c0_6, %c0_7, %c0_8] : memref<1x17x32xf32, #tpu.memory_space<vmem>>, vector<1x17x32xf32>
    %7 = vector.shape_cast %6 : vector<1x17x32xf32> to vector<17x32xf32>
    %8 = vector.shape_cast %5 : vector<17x32xf32> to vector<1x17x32xf32>
    tpu.vector_store %arg5[%c0_6, %c0_7, %c0_8], %8 {strides = array<i32>} : memref<1x17x32xf32, #tpu.memory_space<vmem>>, vector<1x17x32xf32>,
    return
  }
  func.func @transform_0(%arg0: i32, %arg1: i32) -> (i32, i32, i32) {
    %c0_i32 = arith.constant 0 : i32
    %c0_i32_0 = arith.constant 0 : i32
    return %arg1, %arg0, %c0_i32 : i32, i32, i32
  }
  func.func @transform_1(%arg0: i32, %arg1: i32) -> (i32, i32) {
    %c0_i32 = arith.constant 0 : i32
    %c0_i32_0 = arith.constant 0 : i32
    %c0_i32_1 = arith.constant 0 : i32
    return %c0_i32, %c0_i32_0 : i32, i32
  }
  func.func @transform_2(%arg0: i32, %arg1: i32) -> (i32, i32) {
    %c0_i32 = arith.constant 0 : i32
    %c0_i32_0 = arith.constant 0 : i32
    return %arg0, %c0_i32 : i32, i32
  }
  func.func @transform_3(%arg0: i32, %arg1: i32) -> (i32, i32, i32) {
    %c0_i32 = arith.constant 0 : i32
    %c0_i32_0 = arith.constant 0 : i32
    return %arg1, %arg0, %c0_i32 : i32, i32, i32
  }
}

</mosaic_0001>

<bundles_post_ra>
// kernel: tpu_custom_call.1
= control target key start
LH: loop header
LB: loop body
LE: loop exit
PB: predicated region body
PF: predicated region fallthrough
CT: control target
= control target key end

     0   :  { %s598_s12 = smov 0   ;;  %s600_s13 = smov 0   ;;  %s668_s0 = inlined_call_operand.vmem [shape: bf16[2,17,128], index: 0, kind: input, shape index: {}]   ;;  %s669_s1 = inlined_call_operand.vmem [shape: bf16[128,32], index: 1, kind: input, shape index: {}]   ;;  %s670_s2 = inlined_call_operand.vmem [shape: f32[17,32], index: 2, kind: input, shape index: {}]   ;;  %s671_s3 = inlined_call_operand.vmem [shape: f32[2,17,32], index: 3, kind: output, shape index: {}]  }
   0x1   :  { %s602_s14 = smov 0  }
   0x2 LB: > { %s22_s15 = sadd.s32 1, %s572_s13  ;;  %p473_p0 = scmp.ge.s32.totalorder %s576_s14, 1  ;;  %s576_s14 = sphi %s602_s14, %s13_s14   ;;  %s572_s13 = sphi %s600_s13, %s673_s13   ;;  %s568_s12 = sphi %s598_s12, %s672_s12  }
   0x3   : > { %p23_p1 = scmp.ge.s32.totalorder %s22_s15, 2  ;;  %p169_p2 = scmp.lt.s32.totalorder %s576_s14, 3 }
   0x5   : > { %s675_s15 = smov (%p23_p1, %s22_s15), 0  ;;  %p170_p3 = pnand %p473_p0, %p169_p2 }
   0x6   : > { %p207_p4 = scmp.lt.s32.totalorder (!%p170_p3), %s568_s12, 1 }
   0x7   : > { %173 = sbr.rel (%p170_p3) target bundleno = 247 (0xf7), region = 32 }
   0xc   : > { %v544_v0 = vld [vmem:[%s669_s1 + $0x38] sm:$0xff]   ;;  %v545_v1 = vld [vmem:[%s669_s1 + $0x30] sm:$0xff]   ;;  %s677_s12 = smov (!%p207_p4, %s568_s12), 1  ;;  %v546_v2 = vld [vmem:[%s669_s1 + $0x28] sm:$0xff]   ;;  %vm364_vm0 = vcmask 253952   ;;  %vm361_vm1 = vcmask 261120  }
   0xd   : > { %498 = vmatprep.subr.bf16.mxu0 %v544_v0  ;;  %s518_s22 = smul.u32 12, %s677_s12  ;;  %v547_v3 = vld [vmem:[%s669_s1 + $0x20] sm:$0xff]   ;;  %v548_v5 = vld [vmem:[%s669_s1 + $0x18] sm:$0xff]   ;;  %v549_v6 = vld [vmem:[%s669_s1 + $0x10] sm:$0xff]  }
   0xe   : > { %499 = vmatpush3.bf16.msra.mxu0 %v544_v0  ;;  %v550_v7 = vld [vmem:[%s669_s1 + $0x8] sm:$0xff]   ;;  %v551_v8 = vld [vmem:[%s669_s1] sm:$0xff]   ;;  %s519_s9 = smul.u32 24, %s677_s12  ;;  %v254_v10 = vld [vmem:[%s670_s2 + $0x10] sm:$0x1] }
   0xf   : > { %500 = vmatprep.subr.bf16.mxu0 %v545_v1  ;;  %s214_s25 = scalar_lea.vmem %s668_s0, %s518_s22  ;;  %v252_v12 = vld [vmem:[%s670_s2] sm:$0xff]  ;;  %v253_v17 = vld [vmem:[%s670_s2 + $0x8] sm:$0xff] }
  0x10   : > { %v552_v4 = vld [vmem:[%s214_s25] sm:$0xff]   ;;  %v553_v9 = vld [vmem:[%s214_s25 + $0x8] ss:$0 sps:$4 sm:$0x11]   ;;  %s230_s18 = scalar_lea.vmem %s671_s3, %s519_s9 }
  0x11   : > { %514 = vmatprep.mubr.bf16.mxu0 %v552_v4 }
  0x12   : > { %501 = vmatpush3.bf16.msra.mxu0 %v545_v1 }
  0x13   : > { %502 = vmatprep.subr.bf16.mxu0 %v546_v2 }
  0x16   : > { %503 = vmatpush3.bf16.msra.mxu0 %v546_v2 }
  0x17   : > { %504 = vmatprep.subr.bf16.mxu0 %v547_v3 }
  0x1a   : > { %505 = vmatpush3.bf16.msra.mxu0 %v547_v3 }
  0x1b   : > { %506 = vmatprep.subr.bf16.mxu0 %v548_v5 }
  0x1e   : > { %507 = vmatpush3.bf16.msra.mxu0 %v548_v5 }
  0x1f   : > { %508 = vmatprep.subr.bf16.mxu0 %v549_v6 }
  0x22   : > { %509 = vmatpush3.bf16.msra.mxu0 %v549_v6 }
  0x23   : > { %510 = vmatprep.subr.bf16.mxu0 %v550_v7 }
  0x26   : > { %511 = vmatpush3.bf16.msra.mxu0 %v550_v7 }
  0x27   : > { %512 = vmatprep.subr.bf16.mxu0 %v551_v8 }
  0x2a   : > { %513 = vmatpush3.bf16.msra.mxu0 %v551_v8 }
  0x2d   : > { %515 = vmatmul.mubr.bf16.vlgmr.msra.gmra.mxu0 %v553_v9 }
  0xed   : > { %v516_v11 = vpop.f32.mrf.mxu0 }
  0xee   : > { %v356_v13 = vadd.f32 %v516_v11, %v254_v10 }
  0xef   : > { %v347_v14 = vpop.f32.mrf.mxu0 }
  0xf0   : > { %365 = vst.msk [vmem:[%s230_s18 + $0x10] sm:$0x1] %vm364_vm0, %v356_v13  ;;  %v348_v15 = vadd.f32 %v347_v14, %v252_v12 }
  0xf1   : > { %v517_v16 = vpop.f32.mrf.mxu0 }
  0xf2   : > { %362 = vst.msk [vmem:[%s230_s18] sm:$0xff] %vm361_vm1, %v348_v15 }
  0xf3   : > { %v350_v18 = vpop.f32.mrf.mxu0 }
  0xf4   : > { %v351_v19 = vadd.f32 %v350_v18, %v253_v17 }
  0xf6   : > { %363 = vst.msk [vmem:[%s230_s18 + $0x8] sm:$0xff] %vm361_vm1, %v351_v19 }
  0xf7 PF: > { %s13_s14 = sadd.s32 1, %s576_s14   ;;  %s672_s12 = smov %s572_s13 }
  0xf8   : > { %p10_p5 = scmp.ge.s32.totalorder %s13_s14, 4   ;;  %s673_s13 = smov %s675_s15 }
  0xfa   :  { %12 = sbr.rel (!%p10_p5) target bundleno = 2 (0x2), region = 65 }

</bundles_post_ra>
